<compile_context>
chip_gen: v6e
topology: v6e:2x2x1
jax: 0.10.0
libtpu: 0.0.40
codegen_flags: <defaults>
</compile_context>

<pallas_src>
import jax
import jax.numpy as jnp
from jax.experimental import pallas as pl
from jax.experimental.pallas import tpu as pltpu

# Module hyper-parameters (AddMarginLoss.__init__ / FocalLoss.__init__ defaults)
S = 15.0        # scale
M = 0.4         # additive margin
WAYS = 10       # number of classes
GAMMA = 2.0     # focal gamma
EPS = 1e-10     # focal eps (softmax-invariant; only used in the reference)


def _static_pow(x, gamma):
    """x**gamma for a static positive-integer gamma via repeated multiply.

    Avoids the exp/log pow path (NaN at x == 0) and guards against silently
    diverging from the reference if gamma is ever changed to a non-integer.
    """
    g = float(gamma)
    assert g == int(g) and g >= 1, "focal gamma must be a positive integer for this kernel"
    out = x
    for _ in range(int(g) - 1):
        out = out * x
    return out


def add_margin_loss(x, w, label, *, s=S, m=M, gamma=GAMMA, tb=None):
    """x: (B, D) float, w: (WAYS, D) float, label: (B,) int -> scalar float32 loss."""
    b, d = x.shape
    ways, d_w = w.shape
    assert d == d_w, "x and w feature dims must match"
    label2d = label.astype(jnp.int32).reshape(b, 1)

    # Batch tile: multiple of 8 sublanes, sized well inside every generation's
    # VMEM budget (v7x: 64 MiB physical / 32 MiB scoped; 512 rows of f32 is tiny).
    if tb is None:
        tb = 512
    tb = max(8, (min(tb, b) // 8) * 8)
    if tb >= b:
        tb = b  # single full-array block (lifts the /8 requirement for tiny B)
    n_blocks = pl.cdiv(b, tb)
    inv_b = 1.0 / b

    def kernel(x_ref, w_ref, label_ref, out_ref, acc_ref):
        i = pl.program_id(0)

        @pl.when(i == 0)
        def _init():
            acc_ref[...] = jnp.zeros_like(acc_ref)

        xb = x_ref[...].astype(jnp.float32)        # (tb, d)   elementwise math in f32
        wb = w_ref[...].astype(jnp.float32)        # (ways, d)
        lbl = label_ref[...]                       # (tb, 1) int32

        # F.normalize(dim=-1) on both operands (clamp mirrors F.normalize's eps).
        xn = xb * jax.lax.rsqrt(
            jnp.maximum(jnp.sum(xb * xb, axis=-1, keepdims=True), 1e-24))
        wn = wb * jax.lax.rsqrt(
            jnp.maximum(jnp.sum(wb * wb, axis=-1, keepdims=True), 1e-24))

        # cosine = xn @ wn.T : contract the feature axis of both, on the MXU.
        cos = jax.lax.dot_general(
            xn, wn, (((1,), (1,)), ((), ())),
            preferred_element_type=jnp.float32)    # (tb, ways)

        cls_idx = jax.lax.broadcasted_iota(jnp.int32, (tb, ways), 1)
        is_tgt = cls_idx == lbl
        # one_hot*(cos - m) + (1 - one_hot)*cos == cos - m*one_hot ; then *= s.
        metric = (cos - m * is_tgt.astype(jnp.float32)) * s

        # Per-row cross entropy via a stable logsumexp over the class axis.
        m_max = jnp.max(metric, axis=-1, keepdims=True)
        lse = jnp.log(jnp.sum(jnp.exp(metric - m_max), axis=-1, keepdims=True)) + m_max
        tgt_logit = jnp.sum(jnp.where(is_tgt, metric, 0.0), axis=-1, keepdims=True)
        ce = lse - tgt_logit                       # (tb, 1)

        # Mask padded rows of a ragged final tile (global row index >= B).
        row = jax.lax.broadcasted_iota(jnp.int32, (tb, 1), 0) + i * tb
        ce = jnp.where(row < b, ce, 0.0)

        acc_ref[...] = acc_ref[...] + jnp.sum(ce)

        @pl.when(i == pl.num_programs(0) - 1)
        def _finalize():
            L = acc_ref[...] * inv_b               # (1, 1) mean CE over the batch
            p = jnp.exp(-L)
            out_ref[...] = (_static_pow(1.0 - p, gamma) * L).astype(out_ref.dtype)

    out = pl.pallas_call(
        kernel,
        out_shape=jax.ShapeDtypeStruct((1, 1), jnp.float32),
        grid=(n_blocks,),
        in_specs=[
            pl.BlockSpec((tb, d), lambda i: (i, 0)),       # x tile
            pl.BlockSpec((ways, d), lambda i: (0, 0)),     # full w, resident
            pl.BlockSpec((tb, 1), lambda i: (i, 0)),       # labels, lane-narrow int32
        ],
        out_specs=pl.BlockSpec((1, 1), lambda i: (0, 0)),
        scratch_shapes=[pltpu.VMEM((1, 1), jnp.float32)],  # running CE sum
        compiler_params=pltpu.CompilerParams(
            dimension_semantics=("arbitrary",)),           # shared scalar accumulator
        # TODO(synk): for very large B on v7x, emit per-tile partial CE sums with a
        # "parallel" batch axis and reduce in the wrapper to use the second TensorCore.
    )(x, w, label2d)
    return out[0, 0]


def _reference(x, w, label, *, s=S, m=M, ways=WAYS, gamma=GAMMA, eps=EPS):
    # Pure-JAX reference mirroring the PyTorch forward (cosine -> AddMargin -> Focal).
    xn = x / jnp.linalg.norm(x, axis=-1, keepdims=True)
    wn = w / jnp.linalg.norm(w, axis=-1, keepdims=True)
    cos = xn @ wn.T
    one_hot = jax.nn.one_hot(label, ways, dtype=jnp.float32)
    metric = (one_hot * (cos - m) + (1.0 - one_hot) * cos) * s + eps
    logp = jax.nn.log_softmax(metric, axis=-1)
    L = -jnp.mean(jnp.sum(one_hot * logp, axis=-1))
    p = jnp.exp(-L)
    return (1.0 - p) ** gamma * L


if __name__ == "__main__":
    key = jax.random.PRNGKey(0)
    k_x, k_w, k_l = jax.random.split(key, 3)

    B, D = 8, 32
    x = jax.random.normal(k_x, (B, D), dtype=jnp.float32)
    w = jax.random.normal(k_w, (WAYS, D), dtype=jnp.float32)
    label = jax.random.randint(k_l, (B,), 0, WAYS, dtype=jnp.int32)

    loss = add_margin_loss(x, w, label)
    jax.block_until_ready(loss)

    ref = _reference(x, w, label)
    assert jnp.isfinite(loss), "loss is not finite"
    assert jnp.allclose(loss, ref, rtol=1e-4, atol=1e-5), (loss, ref)

    print("KERNEL_OK")
</pallas_src>

<mosaic_0001>
module attributes {stable_mosaic.version = 11 : i64} {
  func.func @kernel(%arg0: i32, %arg1: memref<8x32xf32, #tpu.memory_space<vmem>>, %arg2: memref<10x32xf32, #tpu.memory_space<vmem>>, %arg3: memref<8x1xi32, #tpu.memory_space<vmem>>, %arg4: memref<1x1xf32, #tpu.memory_space<vmem>>, %arg5: memref<1x1xf32, #tpu.memory_space<vmem>>) attributes {dimension_semantics = [#tpu.dimension_semantics<arbitrary>], iteration_bounds = array<i64: 1>, scalar_prefetch = 0 : i64, scratch_operands = 1 : i64, tpu.core_type = #tpu.core_type<tc>, window_params = [{transform_indices = @transform_0, window_bounds = array<i64: 8, 32>}, {pipeline_mode = #tpu.pipeline_mode<synchronous>, transform_indices = @transform_1, window_bounds = array<i64: 10, 32>}, {transform_indices = @transform_2, window_bounds = array<i64: 8, 1>}, {pipeline_mode = #tpu.pipeline_mode<synchronous>, transform_indices = @transform_3, window_bounds = array<i64: 1, 1>}]} {
    %c0_i32 = arith.constant 0 : i32
    %0 = arith.cmpi eq, %arg0, %c0_i32 : i32
    %1 = arith.extui %0 : i1 to i32
    %c0_i32_0 = arith.constant 0 : i32
    %2 = arith.cmpi ne, %1, %c0_i32_0 : i32
    scf.if %2 {
      %cst_25 = arith.constant 0.000000e+00 : f32
      %66 = vector.broadcast %cst_25 : f32 to vector<1x1xf32>
      %c0_26 = arith.constant 0 : index
      %c0_27 = arith.constant 0 : index
      %67 = vector.load %arg5[%c0_26, %c0_27] : memref<1x1xf32, #tpu.memory_space<vmem>>, vector<1x1xf32>
      tpu.vector_store %arg5[%c0_26, %c0_27], %66 {strides = array<i32>} : memref<1x1xf32, #tpu.memory_space<vmem>>, vector<1x1xf32>,
    } else {
    }
    %c0 = arith.constant 0 : index
    %c0_1 = arith.constant 0 : index
    %3 = vector.load %arg1[%c0, %c0_1] : memref<8x32xf32, #tpu.memory_space<vmem>>, vector<8x32xf32>
    %c0_2 = arith.constant 0 : index
    %c0_3 = arith.constant 0 : index
    %4 = vector.load %arg2[%c0_2, %c0_3] : memref<10x32xf32, #tpu.memory_space<vmem>>, vector<10x32xf32>
    %c0_4 = arith.constant 0 : index
    %c0_5 = arith.constant 0 : index
    %5 = vector.load %arg3[%c0_4, %c0_5] : memref<8x1xi32, #tpu.memory_space<vmem>>, vector<8x1xi32>
    %6 = arith.mulf %3, %3 : vector<8x32xf32>
    %cst = arith.constant dense<0.000000e+00> : vector<8xf32>
    %7 = vector.multi_reduction <add>, %6, %cst [1] : vector<8x32xf32> to vector<8xf32>
    %8 = vector.shape_cast %7 : vector<8xf32> to vector<8x1xf32>
    %cst_6 = arith.constant 1.000000e-24 : f32
    %9 = vector.broadcast %cst_6 : f32 to vector<8x1xf32>
    %10 = arith.maximumf %8, %9 : vector<8x1xf32>
    %11 = math.rsqrt %10 : vector<8x1xf32>
    %12 = vector.broadcast %11 : vector<8x1xf32> to vector<8x32xf32>
    %13 = arith.mulf %3, %12 : vector<8x32xf32>
    %14 = arith.mulf %4, %4 : vector<10x32xf32>
    %cst_7 = arith.constant dense<0.000000e+00> : vector<10xf32>
    %15 = vector.multi_reduction <add>, %14, %cst_7 [1] : vector<10x32xf32> to vector<10xf32>
    %16 = vector.shape_cast %15 : vector<10xf32> to vector<10x1xf32>
    %cst_8 = arith.constant 1.000000e-24 : f32
    %17 = vector.broadcast %cst_8 : f32 to vector<10x1xf32>
    %18 = arith.maximumf %16, %17 : vector<10x1xf32>
    %19 = math.rsqrt %18 : vector<10x1xf32>
    %20 = vector.broadcast %19 : vector<10x1xf32> to vector<10x32xf32>
    %21 = arith.mulf %4, %20 : vector<10x32xf32>
    %cst_9 = arith.constant dense<0.000000e+00> : vector<8x10xf32>
    %22 = tpu.matmul %13, %21, %cst_9 {dimension_numbers = #tpu.dot_dimension_numbers<[1], [1], [0], [0], [0, 0, 1, 0], [], []>} : vector<8x32xf32>, vector<10x32xf32>, vector<8x10xf32> -> vector<8x10xf32>
    %23 = tpu.iota {dimensions = array<i32: 1>} : vector<8x10xi32>
    %24 = vector.broadcast %5 : vector<8x1xi32> to vector<8x10xi32>
    %25 = arith.cmpi eq, %23, %24 : vector<8x10xi32>
    %26 = arith.extui %25 : vector<8x10xi1> to vector<8x10xi32>
    %27 = arith.sitofp %26 : vector<8x10xi32> to vector<8x10xf32>
    %cst_10 = arith.constant 4.000000e-01 : f32
    %28 = vector.broadcast %cst_10 : f32 to vector<8x10xf32>
    %29 = arith.mulf %28, %27 : vector<8x10xf32>
    %30 = arith.subf %22, %29 : vector<8x10xf32>
    %cst_11 = arith.constant 1.500000e+01 : f32
    %31 = vector.broadcast %cst_11 : f32 to vector<8x10xf32>
    %32 = arith.mulf %30, %31 : vector<8x10xf32>
    %cst_12 = arith.constant dense<0xFF800000> : vector<8xf32>
    %33 = vector.multi_reduction <maximumf>, %32, %cst_12 [1] : vector<8x10xf32> to vector<8xf32>
    %34 = vector.shape_cast %33 : vector<8xf32> to vector<8x1xf32>
    %35 = vector.broadcast %34 : vector<8x1xf32> to vector<8x10xf32>
    %36 = arith.subf %32, %35 : vector<8x10xf32>
    %37 = math.exp %36 : vector<8x10xf32>
    %cst_13 = arith.constant dense<0.000000e+00> : vector<8xf32>
    %38 = vector.multi_reduction <add>, %37, %cst_13 [1] : vector<8x10xf32> to vector<8xf32>
    %39 = vector.shape_cast %38 : vector<8xf32> to vector<8x1xf32>
    %40 = math.log %39 : vector<8x1xf32>
    %41 = arith.addf %40, %34 : vector<8x1xf32>
    %cst_14 = arith.constant 0.000000e+00 : f32
    %42 = vector.broadcast %cst_14 : f32 to vector<8x10xf32>
    %43 = arith.select %25, %32, %42 : vector<8x10xi1>, vector<8x10xf32>
    %cst_15 = arith.constant dense<0.000000e+00> : vector<8xf32>
    %44 = vector.multi_reduction <add>, %43, %cst_15 [1] : vector<8x10xf32> to vector<8xf32>
    %45 = vector.shape_cast %44 : vector<8xf32> to vector<8x1xf32>
    %46 = arith.subf %41, %45 : vector<8x1xf32>
    %47 = tpu.iota {dimensions = array<i32: 0>} : vector<8x1xi32>
    %c8_i32 = arith.constant 8 : i32
    %48 = arith.muli %arg0, %c8_i32 : i32
    %49 = vector.broadcast %48 : i32 to vector<8x1xi32>
    %50 = arith.addi %47, %49 : vector<8x1xi32>
    %c8_i32_16 = arith.constant 8 : i32
    %51 = vector.broadcast %c8_i32_16 : i32 to vector<8x1xi32>
    %52 = arith.cmpi slt, %50, %51 : vector<8x1xi32>
    %cst_17 = arith.constant 0.000000e+00 : f32
    %53 = vector.broadcast %cst_17 : f32 to vector<8x1xf32>
    %54 = arith.select %52, %46, %53 : vector<8x1xi1>, vector<8x1xf32>
    %c0_18 = arith.constant 0 : index
    %c0_19 = arith.constant 0 : index
    %55 = vector.load %arg5[%c0_18, %c0_19] : memref<1x1xf32, #tpu.memory_space<vmem>>, vector<1x1xf32>
    %56 = vector.shape_cast %54 : vector<8x1xf32> to vector<1x8x1xf32>
    %cst_20 = arith.constant dense<0.000000e+00> : vector<1xf32>
    %57 = vector.multi_reduction <add>, %56, %cst_20 [1, 2] : vector<1x8x1xf32> to vector<1xf32>
    %58 = vector.shape_cast %57 : vector<1xf32> to vector<1x1x1xf32>
    %59 = vector.extract %58[0, 0, 0] : f32 from vector<1x1x1xf32>
    %60 = vector.broadcast %59 : f32 to vector<1x1xf32>
    %61 = arith.addf %55, %60 : vector<1x1xf32>
    %c0_21 = arith.constant 0 : index
    %c0_22 = arith.constant 0 : index
    %62 = vector.load %arg5[%c0_21, %c0_22] : memref<1x1xf32, #tpu.memory_space<vmem>>, vector<1x1xf32>
    tpu.vector_store %arg5[%c0_21, %c0_22], %61 {strides = array<i32>} : memref<1x1xf32, #tpu.memory_space<vmem>>, vector<1x1xf32>,
    %c0_i32_23 = arith.constant 0 : i32
    %63 = arith.cmpi eq, %arg0, %c0_i32_23 : i32
    %64 = arith.extui %63 : i1 to i32
    %c0_i32_24 = arith.constant 0 : i32
    %65 = arith.cmpi ne, %64, %c0_i32_24 : i32
    scf.if %65 {
      %c0_25 = arith.constant 0 : index
      %c0_26 = arith.constant 0 : index
      %66 = vector.load %arg5[%c0_25, %c0_26] : memref<1x1xf32, #tpu.memory_space<vmem>>, vector<1x1xf32>
      %cst_27 = arith.constant 1.250000e-01 : f32
      %67 = vector.broadcast %cst_27 : f32 to vector<1x1xf32>
      %68 = arith.mulf %66, %67 : vector<1x1xf32>
      %cst_28 = arith.constant 0.000000e+00 : f32
      %69 = vector.broadcast %cst_28 : f32 to vector<1x1xf32>
      %70 = arith.subf %69, %68 : vector<1x1xf32>
      %71 = math.exp %70 : vector<1x1xf32>
      %cst_29 = arith.constant 1.000000e+00 : f32
      %72 = vector.broadcast %cst_29 : f32 to vector<1x1xf32>
      %73 = arith.subf %72, %71 : vector<1x1xf32>
      %74 = arith.mulf %73, %73 : vector<1x1xf32>
      %75 = arith.mulf %74, %68 : vector<1x1xf32>
      %c0_30 = arith.constant 0 : index
      %c0_31 = arith.constant 0 : index
      %76 = vector.load %arg4[%c0_30, %c0_31] : memref<1x1xf32, #tpu.memory_space<vmem>>, vector<1x1xf32>
      tpu.vector_store %arg4[%c0_30, %c0_31], %75 {strides = array<i32>} : memref<1x1xf32, #tpu.memory_space<vmem>>, vector<1x1xf32>,
    } else {
    }
    return
  }
  func.func @transform_0(%arg0: i32) -> (i32, i32) {
    %c0_i32 = arith.constant 0 : i32
    %c0_i32_0 = arith.constant 0 : i32
    return %arg0, %c0_i32 : i32, i32
  }
  func.func @transform_1(%arg0: i32) -> (i32, i32) {
    %c0_i32 = arith.constant 0 : i32
    %c0_i32_0 = arith.constant 0 : i32
    %c0_i32_1 = arith.constant 0 : i32
    return %c0_i32, %c0_i32_0 : i32, i32
  }
  func.func @transform_2(%arg0: i32) -> (i32, i32) {
    %c0_i32 = arith.constant 0 : i32
    %c0_i32_0 = arith.constant 0 : i32
    return %arg0, %c0_i32 : i32, i32
  }
  func.func @transform_3(%arg0: i32) -> (i32, i32) {
    %c0_i32 = arith.constant 0 : i32
    %c0_i32_0 = arith.constant 0 : i32
    %c0_i32_1 = arith.constant 0 : i32
    return %c0_i32, %c0_i32_0 : i32, i32
  }
}

</mosaic_0001>

<bundles_post_ra>
// kernel: tpu_custom_call.1
= control target key start
LH: loop header
LB: loop body
LE: loop exit
PB: predicated region body
PF: predicated region fallthrough
CT: control target
= control target key end

     0   :  { %8 = vsyncpa [#allocation4], 0  ;;  %s350_s0 = inlined_call_operand.vmem [shape: f32[8,32], index: 0, kind: input, shape index: {}]   ;;  %s351_s1 = inlined_call_operand.hbm [shape: f32[10,32], index: 1, kind: input, shape index: {}]   ;;  %s352_s2 = inlined_call_operand.vmem [shape: s32[8,1], index: 2, kind: input, shape index: {}]   ;;  %s353_s3 = inlined_call_operand.hbm [shape: f32[1,1], index: 3, kind: output, shape index: {}]  }
   0x1   :  { %9 = vsyncpa [#allocation5], 0  ;;  %s301_s12 = smov [#allocation3]  }
   0x2   :  { %s17_s13 = sshll.u32 %s301_s12, 4  ;;  %s18_s13 = int_to_ptr.vmem [resolvable:$true] %s17_s13 }
   0x3   :  { %s265_s14 = scalar_lea.vmem %s18_s13, 256  ;;  %p270_p1 = scmp.lt.s32.totalorder %s18_s13, %s18_s13 }
   0x4   :  { %p266_p0 = scmp.ne.s32.totalorder %s18_s13, %s265_s14  ;;  %p271_p2 = scmp.lt.s32.totalorder %s265_s14, %s265_s14 }
   0x6   :  { %p272_p3 = por %p271_p2, %p270_p1 }
   0x8   :  { %p273_p4 = pnand %p272_p3, %p266_p0 }
   0xa   :  { %276 = shalt.err (!%p273_p4)
}
   0xb   :  { %s302_s15 = smov 128   ;;  %s303_s16 = smov 8  }
   0xc   :  { %23 = dma.hbm_to_vmem [thread:$0]  %s351_s1, 256, %s18_s13, [#allocation4], %s302_s15, %s302_s15, %s303_s16  }
   0xd   :  { %297 = dma.done.wait [#allocation4], 256  }
   0xe   :  { %298 = vsyncadd [#allocation4], 4294967040  ;;  %v37_v0 = vld [vmem:[#allocation3 + $0x8] sm:$0x3]  ;;  %vm52_vm0 = vcmask 254976   ;;  %v36_v1 = vld [vmem:[#allocation3] sm:$0xff]  ;;  %v141_v24 = vlaneseq }
   0xf   :  { %v35_v2 = vld [vmem:[%s350_s0] sm:$0xff]  ;;  %v48_v3 = vmul.f32 %v37_v0, %v37_v0  ;;  %v47_v4 = vmul.f32 %v36_v1, %v36_v1  ;;  %vm40_vm1 = vcmask 261120   ;;  %v304_v9 = vmov 0.0  }
  0x10   :  { %v39_v5 = vmul.f32 %v35_v2, %v35_v2  ;;  %227 = vmatprep.subr.mxu0 %v304_v9  ;;  %vm305_vm2 = vmmov 0   ;;  %v38_v10 = vld [vmem:[%s352_s2] sm:$0xff]  ;;  %v306_v11 = vmov 0   ;;  %v142_v25 = vand.u32 127, %v141_v24  ;;  %s307_s2 = smov [#allocation6]  }
  0x11   :  { %v53_v6 = vsel %vm52_vm0, %v48_v3, 0.0  ;;  %v49_v8 = vsel %vm40_vm1, %v47_v4, 0.0  ;;  %231 = vmatprep.mubr.msk.f32.mxu0 %vm305_vm2, %v304_v9  ;;  %243 = vset.pattern.permute.xlu1 %v306_v11  ;;  %vm152_vm4 = vcmask 80896   ;;  %vm178_vm5 = vcmask 7168   ;;  %s211_s22 = sshll.u32 %s307_s2, 4  ;;  %s212_s22 = int_to_ptr.vmem [resolvable:$true] %s211_s22 }
  0x12   :  { %v41_v7 = vsel %vm40_vm1, %v39_v5, 0.0  ;;  %54 = vadd.xlane.f32.xlu0 %v53_v6  ;;  %vm33_vm6 = vcmask 0   ;;  %s277_s23 = scalar_lea.vmem %s212_s22, 16  ;;  %s281_s24 = scalar_lea.vmem %s212_s22, 32 }
  0x13   :  { %42 = vadd.xlane.f32.xlu1 %v41_v7  ;;  %244 = vset.pattern.permute.xlu0 %v306_v11  ;;  %34 = vst.msk [vmem:[#allocation2] sm:$0x1] %vm33_vm6, %v304_v9  ;;  %p278_p5 = scmp.ne.s32.totalorder %s212_s22, %s277_s23  ;;  %p282_p6 = scmp.lt.s32.totalorder %s212_s22, %s212_s22 }
  0x14   :  { %p283_p7 = scmp.lt.s32.totalorder %s281_s24, %s277_s23 }
  0x16   :  { %50 = vadd.xlane.f32.xlu0 %v49_v8  ;;  %p284_p8 = por %p283_p7, %p282_p6 }
  0x18   :  { %p285_p9 = pnand %p284_p8, %p278_p5 }
  0x1a   :  { %v177_v55 = vld [vmem:[#allocation2] sm:$0x1] }
  0x24   :  { %144 = vperm.xlu1 %243, %v38_v10  }
  0x9b   :  { %v55_v12 = vpop.xlane.xlu0 %54 }
  0x9c   :  { %v43_v13 = vpop.xlane.xlu1 %42  ;;  %v57_v14 = vmax.f32 %v55_v12, 1e-24 }
  0x9d   :  { %v44_v15 = vmax.f32 %v43_v13, 1e-24 }
  0x9e   :  { %245 = vrsqrt.f32 %v57_v14 }
  0x9f   :  { %v51_v16 = vpop.xlane.xlu0 %50  ;;  %247 = vrsqrt.f32 %v44_v15 }
  0xa0   :  { %v56_v17 = vmax.f32 %v51_v16, 1e-24  ;;  %v145_v26 = vpop.permute.xlu1 %144 }
  0xa1   :  { %vm146_vm3 = vcmp.eq.s32.totalorder %v142_v25, %v145_v26 }
  0xa2   :  { %249 = vrsqrt.f32 %v56_v17  ;;  %v223_v27 = vsel %vm146_vm3, 1.0, %v304_v9 }
  0xa3   :  { %v149_v28 = vmul.f32 0.4, %v223_v27 }
  0xab   :  { %v246_v18 = vpop.eup %245 }
  0xac   :  { %v61_v19 = vmul.f32 %v246_v18, %v37_v0  ;;  %v248_v20 = vpop.eup %247 }
  0xad   :  { %v46_v23 = vmul.f32 %v248_v20, %v35_v2 }
  0xae   :  { %228 = vmatpush3.xpose.msk.msra.mxu0 %vm40_vm1, %v61_v19 }
  0xaf   :  { %v250_v21 = vpop.eup %249  ;;  %229 = vmatprep.subr.mxu0 %v304_v9 }
  0xb0   :  { %v60_v22 = vmul.f32 %v250_v21, %v36_v1 }
  0xb2   :  { %230 = vmatpush3.xpose.msk.msra.mxu0 %vm40_vm1, %v60_v22 }
  0xb5   :  { %232 = vmatmul.mubr.msk.f32.vlgmr.msra.gmra.mxu0 %vm40_vm1, %v46_v23 }
 0x175   :  { %v137_v29 = vpop.f32.mrf.mxu0 }
 0x176   :  { %v150_v30 = vsub.f32 %v137_v29, %v149_v28 }
 0x177   :  { %v233_v31 = vpop.f32.mrf.mxu0 }
 0x178   :  { %v151_v32 = vmul.f32 15.0, %v150_v30 }
 0x17a   :  { %v153_v33 = vsel %vm152_vm4, %v151_v32, -inf  ;;  %v165_v39 = vsel %vm146_vm3, %v151_v32, 0.0 }
 0x17b   :  { %154 = vmax.xlane.f32.xlu0 %v153_v33  ;;  %v166_v40 = vsel %vm152_vm4, %v165_v39, 0.0 }
 0x204   :  { %v155_v34 = vpop.xlane.xlu0 %154 }
 0x205   :  { %v156_v35 = vsub.f32 %v151_v32, %v155_v34 }
 0x207   :  { %v157_v36 = vmul.f32 1.442695, %v156_v35 }
 0x209   :  { %251 = vpow2.f32 %v157_v36 }
 0x216   :  { %v252_v37 = vpop.eup %251 }
 0x217   :  { %v159_v38 = vsel %vm152_vm4, %v252_v37, 0.0 }
 0x218   :  { %160 = vadd.xlane.f32.xlu0 %v159_v38 }
 0x21c   :  { %167 = vadd.xlane.f32.xlu0 %v166_v40 }
 0x2a1   :  { %v161_v41 = vpop.xlane.xlu0 %160 }
 0x2a2   :  { %253 = vlog2.f32 %v161_v41 }
 0x2a5   :  { %v168_v45 = vpop.xlane.xlu0 %167 }
 0x2af   :  { %v254_v42 = vpop.eup %253 }
 0x2b0   :  { %v163_v43 = vmul.f32 0.6931472, %v254_v42 }
 0x2b2   :  { %v164_v44 = vadd.f32 %v163_v43, %v155_v34 }
 0x2b4   :  { %v169_v46 = vsub.f32 %v164_v44, %v168_v45 }
 0x2b6   :  { %v179_v47 = vsel %vm178_vm5, %v169_v46, 0.0 }
 0x2b7   :  { %180 = vadd.xlane.f32.xlu0 %v179_v47 }
 0x340   :  { %v181_v48 = vpop.xlane.xlu0 %180 }
 0x341   :  { %v182_v49 = vrot.slane %v181_v48, 4 }
 0x343   :  { %v183_v50 = vadd.f32 %v182_v49, %v181_v48 }
 0x345   :  { %v184_v51 = vrot.slane %v183_v50, 2 }
 0x347   :  { %v185_v52 = vadd.f32 %v184_v51, %v183_v50 }
 0x349   :  { %v186_v53 = vrot.slane %v185_v52, 1 }
 0x34b   :  { %v187_v54 = vadd.f32 %v186_v53, %v185_v52 }
 0x34d   :  { %234 = vpush %v187_v54 }
 0x37e   :  { %s235_s0 = spop %234 }
 0x37f   :  { %v189_v56 = vstv %s235_s0 }
 0x380   :  { %v190_v57 = vadd.f32 %v189_v56, %v177_v55 }
 0x382   :  { %192 = vst.msk [vmem:[#allocation2] sm:$0x1] %vm33_vm6, %v190_v57 }
 0x389   :  { %v196_v58 = vld [vmem:[#allocation2] sm:$0x1] }
 0x38a   :  { %v197_v59 = vmul.f32 0.125, %v196_v58 }
 0x38c   :  { %v198_v60 = vsub.f32 0.0, %v197_v59 }
 0x38e   :  { %v199_v61 = vmul.f32 1.442695, %v198_v60 }
 0x390   :  { %255 = vpow2.f32 %v199_v61 }
 0x39d   :  { %v256_v62 = vpop.eup %255 }
 0x39e   :  { %v201_v63 = vsub.f32 1.0, %v256_v62 }
 0x3a0   :  { %v202_v0 = vmul.f32 %v201_v63, %v201_v63 }
 0x3a2   :  { %v203_v1 = vmul.f32 %v202_v0, %v197_v59 }
 0x3a4   :  { %204 = vst.msk [vmem:[#allocation6] sm:$0x1] %vm33_vm6, %v203_v1 }
 0x3a5   :  { %288 = shalt.err (!%p285_p9)
}
 0x3a6   :  { %214 = dma.vmem_to_hbm [thread:$0]  %s212_s22, 16, %s353_s3, [#allocation5]  }
 0x3a7   :  { %299 = dma.done.wait [#allocation5], 16  }
 0x3a8   :  { %300 = vsyncadd [#allocation5], 4294967280 }
 0x3a9   :  { %218 = vsyncpa [#allocation4], 1 }
 0x3aa   :  { %219 = vsyncpa [#allocation5], 1 }

</bundles_post_ra>
